<compile_context>
chip_gen: v5e
topology: v5e:2x2
jax: 0.10.0
libtpu: 0.0.40
codegen_flags: <defaults>
</compile_context>

<pallas_src>
import jax
import jax.numpy as jnp
from jax.experimental import pallas as pl
from jax.experimental.pallas import tpu as pltpu

KH = KW = 4
STRIDE = 2
PAD = 1
BN_EPS = 1e-5

# For output phase r (= oh % 2), tap dh in {0,1} of the 2-tap conv on the original
# input uses ConvTranspose kernel row kh = _KSEL[r][dh] (same table for columns).
_KSEL = ((3, 1), (2, 0))


def _round_up(x, m):
    return (x + m - 1) // m * m


def _matmul_stats_kernel(p_ref, w_ref, y_ref, sum_ref, ssq_ref):
    # p_ref: (TILE_M, Kp) phase im2col tile;  w_ref: (Kp, Cp) per-phase weight
    # y_ref: (TILE_M, Cp) pre-BN conv output; sum_ref/ssq_ref: (1, Cp) per-tile stats
    y = jnp.dot(p_ref[...], w_ref[...], preferred_element_type=jnp.float32)  # MXU
    y_ref[...] = y
    # Per-channel row reduction on the MXU (ones-row matmul) instead of an XLU
    # cross-sublane reduction.
    ones_row = jnp.ones((1, y.shape[0]), jnp.float32)
    sum_ref[...] = jnp.dot(ones_row, y, preferred_element_type=jnp.float32)
    ssq_ref[...] = jnp.dot(ones_row, y * y, preferred_element_type=jnp.float32)


def _bn_relu_kernel(y_ref, scale_ref, shift_ref, o_ref):
    # y_ref/o_ref: (TILE_M, Cp); scale_ref/shift_ref: (1, Cp)
    z = y_ref[...] * scale_ref[...] + shift_ref[...]   # fused BN apply: single FMA
    o_ref[...] = jnp.maximum(z, 0.0)                   # ReLU


def conv_t_block(x_nchw, w_t, gamma, beta, use_dropout=False):
    """Forward pass of ConvTBlock (training-mode BatchNorm statistics).

    x_nchw: (N, Cin, H, W)
    w_t:    (Cin, Cout, 4, 4)   torch nn.ConvTranspose2d weight layout
    gamma:  (Cout,), beta: (Cout,)   BatchNorm affine parameters
    returns (N, Cout, 2H, 2W)
    """
    # TODO(synk): use_dropout=True path (training-mode nn.Dropout(0.5)) not implemented.
    N, Cin, H, W = x_nchw.shape
    Cout = w_t.shape[1]
    OH, OW = STRIDE * H, STRIDE * W
    M = N * H * W            # rows per phase
    K = 4 * Cin              # 2x2 taps * Cin

    # ---- padded / tiled sizes ----------------------------------------------------
    TILE_M = min(512, _round_up(M, 8))
    M_pad = _round_up(M, TILE_M)
    n_tiles = M_pad // TILE_M
    K_pad = _round_up(K, 8)
    C_pad = _round_up(Cout, 128)
    f32 = jnp.float32

    # ---- per-phase 2x2 im2col on the ORIGINAL input (no zero dilation) -------------
    x = jnp.transpose(x_nchw, (0, 2, 3, 1)).astype(f32)          # NHWC
    xp = jnp.pad(x, ((0, 0), (1, 1), (1, 1), (0, 0)))            # halo of 1
    phase_patches = []
    for r in range(2):
        for s in range(2):
            taps = [xp[:, r + dh:r + dh + H, s + dw:s + dw + W, :]
                    for dh in range(2) for dw in range(2)]
            phase_patches.append(jnp.stack(taps, axis=3).reshape(M, K))  # cols=(tap,ci)
    P_all = jnp.stack(phase_patches, axis=0)                     # (4, M, K)
    P_all = jnp.pad(P_all, ((0, 0), (0, M_pad - M), (0, K_pad - K)))

    # ---- per-phase flattened weights (row order = (tap, ci), matches P columns) ----
    w_f = w_t.astype(f32)                                        # (Cin, Cout, 4, 4)
    phase_w = []
    for r in range(2):
        for s in range(2):
            taps = [w_f[:, :, _KSEL[r][dh], _KSEL[s][dw]]
                    for dh in range(2) for dw in range(2)]       # each (Cin, Cout)
            phase_w.append(jnp.stack(taps, axis=0).reshape(K, Cout))
    W_all = jnp.stack(phase_w, axis=0)                           # (4, K, Cout)
    W_all = jnp.pad(W_all, ((0, 0), (0, K_pad - K), (0, C_pad - Cout)))

    # ---- pass 1: conv matmul + per-channel sum / sum-of-squares --------------------
    flops = 2 * 4 * M_pad * K_pad * C_pad + 2 * 2 * 4 * M_pad * C_pad
    bytes_accessed = 4 * (P_all.size + W_all.size + 4 * M_pad * C_pad
                          + 2 * 4 * n_tiles * C_pad)
    y_all, sums, ssqs = pl.pallas_call(
        _matmul_stats_kernel,
        grid=(4, n_tiles),
        in_specs=[
            pl.BlockSpec((None, TILE_M, K_pad), lambda p, i: (p, i, 0)),
            pl.BlockSpec((None, K_pad, C_pad), lambda p, i: (p, 0, 0)),
        ],
        out_specs=[
            pl.BlockSpec((None, TILE_M, C_pad), lambda p, i: (p, i, 0)),
            pl.BlockSpec((None, None, 1, C_pad), lambda p, i: (p, i, 0, 0)),
            pl.BlockSpec((None, None, 1, C_pad), lambda p, i: (p, i, 0, 0)),
        ],
        out_shape=(
            jax.ShapeDtypeStruct((4, M_pad, C_pad), f32),
            jax.ShapeDtypeStruct((4, n_tiles, 1, C_pad), f32),
            jax.ShapeDtypeStruct((4, n_tiles, 1, C_pad), f32),
        ),
        compiler_params=pltpu.CompilerParams(
            dimension_semantics=("parallel", "parallel"),
            vmem_limit_bytes=32 * 1024 * 1024,
        ),
        cost_estimate=pl.CostEstimate(
            flops=int(flops), transcendentals=0, bytes_accessed=int(bytes_accessed)),
    )(P_all, W_all)

    # ---- fold batch statistics into one scale/shift (tiny per-channel vectors) -----
    count = jnp.asarray(4 * M, f32)                    # = N * OH * OW real rows
    total_sum = jnp.sum(sums, axis=(0, 1, 2))          # (C_pad,)
    total_ssq = jnp.sum(ssqs, axis=(0, 1, 2))
    mean = total_sum / count
    var = jnp.maximum(total_ssq / count - mean * mean, 0.0)
    gamma_p = jnp.pad(gamma.astype(f32), (0, C_pad - Cout))
    beta_p = jnp.pad(beta.astype(f32), (0, C_pad - Cout))
    scale_v = gamma_p * jax.lax.rsqrt(var + BN_EPS)
    shift_v = beta_p - mean * scale_v
    scale = scale_v.reshape(1, C_pad)
    shift = shift_v.reshape(1, C_pad)

    # ---- pass 2: y * scale + shift, ReLU --------------------------------------------
    out_all = pl.pallas_call(
        _bn_relu_kernel,
        grid=(4, n_tiles),
        in_specs=[
            pl.BlockSpec((None, TILE_M, C_pad), lambda p, i: (p, i, 0)),
            pl.BlockSpec((1, C_pad), lambda p, i: (0, 0)),
            pl.BlockSpec((1, C_pad), lambda p, i: (0, 0)),
        ],
        out_specs=pl.BlockSpec((None, TILE_M, C_pad), lambda p, i: (p, i, 0)),
        out_shape=jax.ShapeDtypeStruct((4, M_pad, C_pad), f32),
        compiler_params=pltpu.CompilerParams(
            dimension_semantics=("parallel", "parallel"),
            vmem_limit_bytes=32 * 1024 * 1024,
        ),
    )(y_all, scale, shift)

    # ---- stitch the 4 phases back into (N, Cout, 2H, 2W) ----------------------------
    out = out_all[:, :M, :Cout].reshape(2, 2, N, H, W, Cout)     # [r, s, n, a, b, c]
    out = jnp.transpose(out, (2, 3, 0, 4, 1, 5)).reshape(N, OH, OW, Cout)
    return jnp.transpose(out, (0, 3, 1, 2))                      # NCHW


def _reference(x_nchw, w_t, gamma, beta):
    """Pure-JAX reference (no Pallas) for correctness checking."""
    w_std = jnp.transpose(w_t, (1, 0, 2, 3))[:, :, ::-1, ::-1]   # OIHW, flipped
    y = jax.lax.conv_general_dilated(
        x_nchw.astype(jnp.float32), w_std.astype(jnp.float32),
        window_strides=(1, 1),
        padding=[(KH - 1 - PAD, KH - 1 - PAD)] * 2,
        lhs_dilation=(STRIDE, STRIDE),
        dimension_numbers=("NCHW", "OIHW", "NCHW"),
    )
    mean = jnp.mean(y, axis=(0, 2, 3), keepdims=True)
    var = jnp.mean((y - mean) ** 2, axis=(0, 2, 3), keepdims=True)
    y = (y - mean) / jnp.sqrt(var + BN_EPS)
    y = y * gamma.reshape(1, -1, 1, 1) + beta.reshape(1, -1, 1, 1)
    return jnp.maximum(y, 0.0)


if __name__ == "__main__":
    key = jax.random.PRNGKey(0)
    k_x, k_w, k_g, k_b = jax.random.split(key, 4)

    N, Cin, Cout, H, W = 2, 4, 8, 16, 16
    x = jax.random.normal(k_x, (N, Cin, H, W), dtype=jnp.float32)
    w_t = 0.1 * jax.random.normal(k_w, (Cin, Cout, KH, KW), dtype=jnp.float32)
    gamma = 1.0 + 0.1 * jax.random.normal(k_g, (Cout,), dtype=jnp.float32)
    beta = 0.1 * jax.random.normal(k_b, (Cout,), dtype=jnp.float32)

    out = conv_t_block(x, w_t, gamma, beta, use_dropout=False)
    out = jax.block_until_ready(out)

    ref = jax.block_until_ready(_reference(x, w_t, gamma, beta))

    assert out.shape == (N, Cout, 2 * H, 2 * W), out.shape
    assert jnp.allclose(out, ref, atol=1e-3, rtol=1e-3), (
        float(jnp.max(jnp.abs(out - ref)))
    )
    print("KERNEL_OK")
</pallas_src>

<mosaic_0001>
module attributes {stable_mosaic.version = 11 : i64} {
  func.func @_matmul_stats_kernel(%arg0: i32, %arg1: i32, %arg2: memref<1x512x16xf32, #tpu.memory_space<vmem>>, %arg3: memref<1x16x128xf32, #tpu.memory_space<vmem>>, %arg4: memref<1x512x128xf32, #tpu.memory_space<vmem>>, %arg5: memref<1x1x1x128xf32, #tpu.memory_space<vmem>>, %arg6: memref<1x1x1x128xf32, #tpu.memory_space<vmem>>) attributes {dimension_semantics = [#tpu.dimension_semantics<parallel>, #tpu.dimension_semantics<parallel>], iteration_bounds = array<i64: 4, 1>, scalar_prefetch = 0 : i64, scratch_operands = 0 : i64, tpu.core_type = #tpu.core_type<tc>, window_params = [{transform_indices = @transform_0, window_bounds = array<i64: 1, 512, 16>}, {transform_indices = @transform_1, window_bounds = array<i64: 1, 16, 128>}, {transform_indices = @transform_2, window_bounds = array<i64: 1, 512, 128>}, {transform_indices = @transform_3, window_bounds = array<i64: 1, 1, 1, 128>}, {transform_indices = @transform_4, window_bounds = array<i64: 1, 1, 1, 128>}]} {
    %c0 = arith.constant 0 : index
    %c0_0 = arith.constant 0 : index
    %c0_1 = arith.constant 0 : index
    %0 = vector.load %arg2[%c0, %c0_0, %c0_1] : memref<1x512x16xf32, #tpu.memory_space<vmem>>, vector<1x512x16xf32>
    %1 = vector.shape_cast %0 : vector<1x512x16xf32> to vector<512x16xf32>
    %c0_2 = arith.constant 0 : index
    %c0_3 = arith.constant 0 : index
    %c0_4 = arith.constant 0 : index
    %2 = vector.load %arg3[%c0_2, %c0_3, %c0_4] : memref<1x16x128xf32, #tpu.memory_space<vmem>>, vector<1x16x128xf32>
    %3 = vector.shape_cast %2 : vector<1x16x128xf32> to vector<16x128xf32>
    %cst = arith.constant dense<0.000000e+00> : vector<512x128xf32>
    %4 = tpu.matmul %1, %3, %cst {dimension_numbers = #tpu.dot_dimension_numbers<[1], [0], [0], [1], [0, 0, 1, 1], [], []>} : vector<512x16xf32>, vector<16x128xf32>, vector<512x128xf32> -> vector<512x128xf32>
    %c0_5 = arith.constant 0 : index
    %c0_6 = arith.constant 0 : index
    %c0_7 = arith.constant 0 : index
    %5 = vector.load %arg4[%c0_5, %c0_6, %c0_7] : memref<1x512x128xf32, #tpu.memory_space<vmem>>, vector<1x512x128xf32>
    %6 = vector.shape_cast %5 : vector<1x512x128xf32> to vector<512x128xf32>
    %7 = vector.shape_cast %4 : vector<512x128xf32> to vector<1x512x128xf32>
    tpu.vector_store %arg4[%c0_5, %c0_6, %c0_7], %7 {strides = array<i32>} : memref<1x512x128xf32, #tpu.memory_space<vmem>>, vector<1x512x128xf32>,
    %cst_8 = arith.constant 1.000000e+00 : f32
    %8 = vector.broadcast %cst_8 : f32 to vector<1x512xf32>
    %cst_9 = arith.constant dense<0.000000e+00> : vector<1x128xf32>
    %9 = tpu.matmul %8, %4, %cst_9 {dimension_numbers = #tpu.dot_dimension_numbers<[1], [0], [0], [1], [0, 0, 1, 1], [], []>} : vector<1x512xf32>, vector<512x128xf32>, vector<1x128xf32> -> vector<1x128xf32>
    %c0_10 = arith.constant 0 : index
    %c0_11 = arith.constant 0 : index
    %c0_12 = arith.constant 0 : index
    %c0_13 = arith.constant 0 : index
    %10 = vector.load %arg5[%c0_10, %c0_11, %c0_12, %c0_13] : memref<1x1x1x128xf32, #tpu.memory_space<vmem>>, vector<1x1x1x128xf32>
    %11 = vector.shape_cast %10 : vector<1x1x1x128xf32> to vector<1x128xf32>
    %12 = vector.shape_cast %9 : vector<1x128xf32> to vector<1x1x1x128xf32>
    tpu.vector_store %arg5[%c0_10, %c0_11, %c0_12, %c0_13], %12 {strides = array<i32>} : memref<1x1x1x128xf32, #tpu.memory_space<vmem>>, vector<1x1x1x128xf32>,
    %13 = arith.mulf %4, %4 : vector<512x128xf32>
    %cst_14 = arith.constant dense<0.000000e+00> : vector<1x128xf32>
    %14 = tpu.matmul %8, %13, %cst_14 {dimension_numbers = #tpu.dot_dimension_numbers<[1], [0], [0], [1], [0, 0, 1, 1], [], []>} : vector<1x512xf32>, vector<512x128xf32>, vector<1x128xf32> -> vector<1x128xf32>
    %c0_15 = arith.constant 0 : index
    %c0_16 = arith.constant 0 : index
    %c0_17 = arith.constant 0 : index
    %c0_18 = arith.constant 0 : index
    %15 = vector.load %arg6[%c0_15, %c0_16, %c0_17, %c0_18] : memref<1x1x1x128xf32, #tpu.memory_space<vmem>>, vector<1x1x1x128xf32>
    %16 = vector.shape_cast %15 : vector<1x1x1x128xf32> to vector<1x128xf32>
    %17 = vector.shape_cast %14 : vector<1x128xf32> to vector<1x1x1x128xf32>
    tpu.vector_store %arg6[%c0_15, %c0_16, %c0_17, %c0_18], %17 {strides = array<i32>} : memref<1x1x1x128xf32, #tpu.memory_space<vmem>>, vector<1x1x1x128xf32>,
    return
  }
  func.func @transform_0(%arg0: i32, %arg1: i32) -> (i32, i32, i32) {
    %c0_i32 = arith.constant 0 : i32
    %c0_i32_0 = arith.constant 0 : i32
    return %arg0, %arg1, %c0_i32 : i32, i32, i32
  }
  func.func @transform_1(%arg0: i32, %arg1: i32) -> (i32, i32, i32) {
    %c0_i32 = arith.constant 0 : i32
    %c0_i32_0 = arith.constant 0 : i32
    %c0_i32_1 = arith.constant 0 : i32
    return %arg0, %c0_i32, %c0_i32_0 : i32, i32, i32
  }
  func.func @transform_2(%arg0: i32, %arg1: i32) -> (i32, i32, i32) {
    %c0_i32 = arith.constant 0 : i32
    %c0_i32_0 = arith.constant 0 : i32
    return %arg0, %arg1, %c0_i32 : i32, i32, i32
  }
  func.func @transform_3(%arg0: i32, %arg1: i32) -> (i32, i32, i32, i32) {
    %c0_i32 = arith.constant 0 : i32
    %c0_i32_0 = arith.constant 0 : i32
    %c0_i32_1 = arith.constant 0 : i32
    return %arg0, %arg1, %c0_i32, %c0_i32_0 : i32, i32, i32, i32
  }
  func.func @transform_4(%arg0: i32, %arg1: i32) -> (i32, i32, i32, i32) {
    %c0_i32 = arith.constant 0 : i32
    %c0_i32_0 = arith.constant 0 : i32
    %c0_i32_1 = arith.constant 0 : i32
    return %arg0, %arg1, %c0_i32, %c0_i32_0 : i32, i32, i32, i32
  }
}

</mosaic_0001>

<bundles_post_ra>
// kernel: tpu_custom_call.1
= control target key start
LH: loop header
LB: loop body
LE: loop exit
PB: predicated region body
PF: predicated region fallthrough
CT: control target
= control target key end

     0   :  { %10 = vsyncpa [#allocation3], 0  ;;  %s2251_s0 = inlined_call_operand.vmem [shape: f32[4,512,16], index: 0, kind: input, shape index: {}]   ;;  %s2252_s1 = inlined_call_operand.vmem [shape: f32[4,16,128], index: 1, kind: input, shape index: {}]   ;;  %s2253_s2 = inlined_call_operand.hbm [shape: f32[4,512,128], index: 2, kind: output, shape index: {0}]   ;;  %s2254_s3 = inlined_call_operand.hbm [shape: f32[4,1,1,128], index: 3, kind: output, shape index: {1}]   ;;  %s2255_s4 = inlined_call_operand.hbm [shape: f32[4,1,1,128], index: 4, kind: output, shape index: {2}]  }
   0x1   :  { %12 = vsyncpa [#allocation3 + $0x1], 0 }
   0x2   :  { %13 = vsyncpa [#allocation5], 0 }
   0x3   :  { %15 = vsyncpa [#allocation5 + $0x1], 0  ;;  %s1549_s15 = smov 0   ;;  %s1551_s16 = smov 0  }
   0x4   :  { %s1553_s17 = smov 0   ;;  %s1555_s18 = smov 0  }
   0x5   :  { %s1557_s19 = smov 0   ;;  %s1559_s20 = smov 0  }
   0x6 LB: > { %s2257_s21 = sadd.s32 4294967295, %s1519_s20   ;;  %s2256_s22 = sadd.s32 4294967294, %s1519_s20   ;;  %s1519_s20 = sphi %s1559_s20, %s21_s20   ;;  %s1515_s19 = sphi %s1557_s19, %s2266_s19   ;;  %s1511_s18 = sphi %s1555_s18, %s2265_s18   ;;  %s1507_s17 = sphi %s1553_s17, %s2264_s17   ;;  %s1503_s16 = sphi %s1551_s16, %s2263_s16   ;;  %s1499_s15 = sphi %s1549_s15, %s2262_s15  }
   0x7   : > { %s33_s23 = sadd.s32 1, %s1515_s19  ;;  %s96_s24 = sadd.s32 1, %s1507_s17 }
   0x8   : > { %p35_p0 = scmp.ge.s32.totalorder %s33_s23, 4  ;;  %p106_p1 = scmp.ne.s32.totalorder %s1507_s17, %s1503_s16 }
   0x9   : > { %p107_p2 = scmp.eq.s32.totalorder %s2257_s21, 3  ;;  %p112_p3 = scmp.ne.s32.totalorder %s1503_s16, %s1499_s15 }
   0xa   : > { %s2268_s23 = smov (%p35_p0, %s33_s23), 0  ;;  %p113_p5 = scmp.eq.s32.totalorder %s2256_s22, 3 }
   0xb   : > { %p1591_p4 = por %p107_p2, %p106_p1  ;;  %s91_s26 = ssub.s32 %s1515_s19, %s2268_s23 }
   0xc   : > { %p1229_p6 = scmp.ge.s32.totalorder %s1519_s20, 1  ;;  %p94_p7 = scmp.eq.s32.totalorder %s91_s26, 0 }
   0xd   : > { %p1600_p8 = por %p113_p5, %p112_p3  ;;  %p208_p9 = scmp.lt.s32.totalorder %s1519_s20, 5 }
   0xe   : > { %s1606_s28 = scalar_select %p94_p7, %s1507_s17, %s96_s24  }
   0xf   : > { %p209_p10 = pnand %p1229_p6, %p208_p9 }
  0x10   : > { %p252_p11 = scmp.lt.s32.totalorder (!%p209_p10), %s1511_s18, 3  ;;  %s1724_s12 = sand.u32 (!%p209_p10), 1, %s1503_s16  }
  0x11   : > { %212 = sbr.rel (%p209_p10) target bundleno = 556 (0x22c), region = 28  ;;  %s1230_s13 = sshll.u32 (!%p209_p10), %s1724_s12, 9 }
  0x12   : > { %s1733_s14 = scalar_lea.vmem (!%p209_p10), [#allocation2], %s1230_s13  ;;  %s1306_s24 = sshll.u32 (!%p209_p10), %s1511_s18, 9 }
  0x13   : > { %s1026_s7 = scalar_lea.sflag (!%p209_p10), [#allocation3], %s1724_s12  ;;  %s1401_s13 = scalar_lea.hbm (!%p209_p10), %s2253_s2, 2048 }
  0x16   : > { %s253_s29 = scalar_select %p252_p11, %s1511_s18, 3  ;;  %vm333_vm0 = vcmask 130048  }
  0x18   : > { %s1304_s30 = sshll.u32 %s253_s29, 9  ;;  %s1305_s5 = sshll.u32 %s253_s29, 4 }
  0x19   : > { %s1613_s8 = scalar_lea.vmem %s2251_s0, %s1304_s30  ;;  %s265_s11 = scalar_lea.vmem %s2252_s1, %s1305_s5 }
  0x1a   : > { %v332_v0 = vld [vmem:[%s265_s11 + $0x8] sm:$0xff]  ;;  %v331_v1 = vld [vmem:[%s265_s11] sm:$0xff]  ;;  %v313_v5 = vld [vmem:[%s1613_s8 + $0x170] sm:$0xff]  ;;  %s1047_s30 = scalar_lea.hbm %s2253_s2, %s1306_s24  ;;  %s1048_s5 = sshll.u32 %s1733_s14, 4  ;;  %s1049_s5 = int_to_ptr.vmem [resolvable:$true] %s1048_s5 }
  0x1b   : > { %540 = vmatpush.msra.mxu0 %v332_v0  ;;  %1307 = vmatpush.msra.mxu1 %v332_v0  ;;  %v267_v2 = vld [vmem:[%s1613_s8] sm:$0xff]  ;;  %v304_v4 = vld [vmem:[%s1613_s8 + $0x128] sm:$0xff]  ;;  %v305_v8 = vld [vmem:[%s1613_s8 + $0x130] sm:$0xff]  ;;  %s1050_s6 = sshll.u32 %s1047_s30, 4  ;;  %s1051_s6 = int_to_ptr.hbm [resolvable:$true] %s1050_s6 }
  0x1c   : > { %1308 = vmatpush.msra.mxu2 %v332_v0  ;;  %v291_v3 = vld [vmem:[%s1613_s8 + $0xc0] sm:$0xff]  ;;  %1309 = vmatpush.msra.mxu3 %v332_v0  ;;  %v268_v6 = vld [vmem:[%s1613_s8 + $0x8] sm:$0xff]  ;;  %v314_v9 = vld [vmem:[%s1613_s8 + $0x178] sm:$0xff] }
  0x1d   : > { %541 = vmatpush.msra.mxu0 %v331_v1  ;;  %1310 = vmatpush.msra.mxu1 %v331_v1  ;;  %v292_v7 = vld [vmem:[%s1613_s8 + $0xc8] sm:$0xff]  ;;  %v269_v10 = vld [vmem:[%s1613_s8 + $0x10] sm:$0xff]  ;;  %v306_v12 = vld [vmem:[%s1613_s8 + $0x138] sm:$0xff] }
  0x1e   : > { %1311 = vmatpush.msra.mxu2 %v331_v1  ;;  %1235 = vmatmul.msk.f32.vlgmr.msra.gmra.mxu0 %vm333_vm0, %v267_v2  ;;  %v293_v11 = vld [vmem:[%s1613_s8 + $0xd0] sm:$0xff]  ;;  %v315_v13 = vld [vmem:[%s1613_s8 + $0x180] sm:$0xff]  ;;  %v270_v14 = vld [vmem:[%s1613_s8 + $0x18] sm:$0xff] }
  0x1f   : > { %1259 = vmatmul.msk.f32.vlgmr.msra.gmra.mxu1 %vm333_vm0, %v291_v3  ;;  %1272 = vmatmul.msk.f32.vlgmr.msra.gmra.mxu2 %vm333_vm0, %v304_v4  ;;  %v294_v15 = vld [vmem:[%s1613_s8 + $0xd8] sm:$0xff]  ;;  %v307_v16 = vld [vmem:[%s1613_s8 + $0x140] sm:$0xff]  ;;  %v316_v17 = vld [vmem:[%s1613_s8 + $0x188] sm:$0xff] }
  0x20   : > { %1312 = vmatpush.msra.mxu3 %v331_v1  ;;  %v271_v18 = vld [vmem:[%s1613_s8 + $0x20] sm:$0xff]  ;;  %v308_v20 = vld [vmem:[%s1613_s8 + $0x148] sm:$0xff]  ;;  %v317_v21 = vld [vmem:[%s1613_s8 + $0x190] sm:$0xff] }
  0x21   : > { %1281 = vmatmul.msk.f32.vlgmr.msra.gmra.mxu3 %vm333_vm0, %v313_v5  ;;  %v295_v19 = vld [vmem:[%s1613_s8 + $0xe0] sm:$0xff]  ;;  %v272_v22 = vld [vmem:[%s1613_s8 + $0x28] sm:$0xff]  ;;  %v309_v24 = vld [vmem:[%s1613_s8 + $0x150] sm:$0xff] }
  0x22   : > { %v296_v23 = vld [vmem:[%s1613_s8 + $0xe8] sm:$0xff]  ;;  %v318_v25 = vld [vmem:[%s1613_s8 + $0x198] sm:$0xff]  ;;  %v273_v26 = vld [vmem:[%s1613_s8 + $0x30] sm:$0xff] }
  0x23   : > { %v297_v27 = vld [vmem:[%s1613_s8 + $0xf0] sm:$0xff]  ;;  %v310_v28 = vld [vmem:[%s1613_s8 + $0x158] sm:$0xff]  ;;  %v319_v29 = vld [vmem:[%s1613_s8 + $0x1a0] sm:$0xff] }
  0x24   : > { %v274_v30 = vld [vmem:[%s1613_s8 + $0x38] sm:$0xff]  ;;  %v311_v32 = vld [vmem:[%s1613_s8 + $0x160] sm:$0xff]  ;;  %v320_v33 = vld [vmem:[%s1613_s8 + $0x1a8] sm:$0xff] }
  0x25   : > { %v298_v31 = vld [vmem:[%s1613_s8 + $0xf8] sm:$0xff]  ;;  %v275_v34 = vld [vmem:[%s1613_s8 + $0x40] sm:$0xff]  ;;  %v312_v36 = vld [vmem:[%s1613_s8 + $0x168] sm:$0xff] }
  0x26   : > { %1236 = vmatmul.msk.f32.gmra.mxu0 %vm333_vm0, %v268_v6  ;;  %v299_v35 = vld [vmem:[%s1613_s8 + $0x100] sm:$0xff]  ;;  %v321_v37 = vld [vmem:[%s1613_s8 + $0x1b0] sm:$0xff]  ;;  %v276_v38 = vld [vmem:[%s1613_s8 + $0x48] sm:$0xff] }
  0x27   : > { %1260 = vmatmul.msk.f32.gmra.mxu1 %vm333_vm0, %v292_v7  ;;  %1273 = vmatmul.msk.f32.gmra.mxu2 %vm333_vm0, %v305_v8  ;;  %v300_v39 = vld [vmem:[%s1613_s8 + $0x108] sm:$0xff]  ;;  %v322_v40 = vld [vmem:[%s1613_s8 + $0x1b8] sm:$0xff]  ;;  %v277_v41 = vld [vmem:[%s1613_s8 + $0x50] sm:$0xff] }
  0x28   : > { %v301_v42 = vld [vmem:[%s1613_s8 + $0x110] sm:$0xff]  ;;  %v323_v43 = vld [vmem:[%s1613_s8 + $0x1c0] sm:$0xff]  ;;  %v278_v44 = vld [vmem:[%s1613_s8 + $0x58] sm:$0xff] }
  0x29   : > { %1282 = vmatmul.msk.f32.gmra.mxu3 %vm333_vm0, %v314_v9  ;;  %v302_v45 = vld [vmem:[%s1613_s8 + $0x118] sm:$0xff]  ;;  %v324_v46 = vld [vmem:[%s1613_s8 + $0x1c8] sm:$0xff]  ;;  %v279_v47 = vld [vmem:[%s1613_s8 + $0x60] sm:$0xff] }
  0x2a   : > { %v303_v48 = vld [vmem:[%s1613_s8 + $0x120] sm:$0xff]  ;;  %v325_v49 = vld [vmem:[%s1613_s8 + $0x1d0] sm:$0xff]  ;;  %v280_v50 = vld [vmem:[%s1613_s8 + $0x68] sm:$0xff] }
  0x2b   : > { %v326_v51 = vld [vmem:[%s1613_s8 + $0x1d8] sm:$0xff]  ;;  %v281_v52 = vld [vmem:[%s1613_s8 + $0x70] sm:$0xff]  ;;  %v327_v53 = vld [vmem:[%s1613_s8 + $0x1e0] sm:$0xff] }
  0x2c   : > { %v282_v54 = vld [vmem:[%s1613_s8 + $0x78] sm:$0xff]  ;;  %v328_v55 = vld [vmem:[%s1613_s8 + $0x1e8] sm:$0xff]  ;;  %v283_v57 = vld [vmem:[%s1613_s8 + $0x80] sm:$0xff] }
  0x2d   : > { %v329_v59 = vld [vmem:[%s1613_s8 + $0x1f0] sm:$0xff]  ;;  %v284_v62 = vld [vmem:[%s1613_s8 + $0x88] sm:$0xff]  ;;  %v330_v1 = vld [vmem:[%s1613_s8 + $0x1f8] sm:$0xff] }
  0x2e   : > { %1237 = vmatmul.msk.f32.gmra.mxu0 %vm333_vm0, %v269_v10  ;;  %v285_v4 = vld [vmem:[%s1613_s8 + $0x90] sm:$0xff]  ;;  %v286_v9 = vld [vmem:[%s1613_s8 + $0x98] sm:$0xff] }
  0x2f   : > { %1261 = vmatmul.msk.f32.gmra.mxu1 %vm333_vm0, %v293_v11  ;;  %1274 = vmatmul.msk.f32.gmra.mxu2 %vm333_vm0, %v306_v12 }
  0x31   : > { %1283 = vmatmul.msk.f32.gmra.mxu3 %vm333_vm0, %v315_v13 }
  0x36   : > { %1238 = vmatmul.msk.f32.gmra.mxu0 %vm333_vm0, %v270_v14  ;;  %v287_v14 = vld [vmem:[%s1613_s8 + $0xa0] sm:$0xff] }
  0x37   : > { %1262 = vmatmul.msk.f32.gmra.mxu1 %vm333_vm0, %v294_v15  ;;  %1275 = vmatmul.msk.f32.gmra.mxu2 %vm333_vm0, %v307_v16 }
  0x39   : > { %1284 = vmatmul.msk.f32.gmra.mxu3 %vm333_vm0, %v316_v17 }
  0x3e   : > { %1239 = vmatmul.msk.f32.gmra.mxu0 %vm333_vm0, %v271_v18 }
  0x3f   : > { %1263 = vmatmul.msk.f32.gmra.mxu1 %vm333_vm0, %v295_v19  ;;  %1276 = vmatmul.msk.f32.gmra.mxu2 %vm333_vm0, %v308_v20  ;;  %v288_v19 = vld [vmem:[%s1613_s8 + $0xa8] sm:$0xff] }
  0x41   : > { %1285 = vmatmul.msk.f32.gmra.mxu3 %vm333_vm0, %v317_v21 }
  0x46   : > { %1240 = vmatmul.msk.f32.gmra.mxu0 %vm333_vm0, %v272_v22 }
  0x47   : > { %1264 = vmatmul.msk.f32.gmra.mxu1 %vm333_vm0, %v296_v23  ;;  %1277 = vmatmul.msk.f32.gmra.mxu2 %vm333_vm0, %v309_v24  ;;  %v289_v24 = vld [vmem:[%s1613_s8 + $0xb0] sm:$0xff] }
  0x49   : > { %1286 = vmatmul.msk.f32.gmra.mxu3 %vm333_vm0, %v318_v25 }
  0x4e   : > { %1241 = vmatmul.msk.f32.gmra.mxu0 %vm333_vm0, %v273_v26 }
  0x4f   : > { %1265 = vmatmul.msk.f32.gmra.mxu1 %vm333_vm0, %v297_v27  ;;  %1278 = vmatmul.msk.f32.gmra.mxu2 %vm333_vm0, %v310_v28 }
  0x51   : > { %1287 = vmatmul.msk.f32.gmra.mxu3 %vm333_vm0, %v319_v29  ;;  %v290_v29 = vld [vmem:[%s1613_s8 + $0xb8] sm:$0xff]  ;;  %s1395_s8 = sshra.s32 %s1051_s6, 4  ;;  %s1396_s8 = int_to_ptr.hbm [resolvable:$true] %s1395_s8 }
  0x52   : > { %s1397_s9 = scalar_lea.hbm %s1396_s8, 512  ;;  %p1402_p1 = scmp.lt.s32.totalorder %s1396_s8, %s2253_s2 }
  0x53   : > { %p1398_p12 = scmp.ne.s32.totalorder %s1396_s8, %s1397_s9  ;;  %p1403_p2 = scmp.lt.s32.totalorder %s1401_s13, %s1397_s9 }
  0x55   : > { %p1399_p13 = pnand %p1398_p12, %p1591_p4  ;;  %p1404_p3 = por %p1403_p2, %p1402_p1 }
  0x56   : > { %1242 = vmatmul.msk.f32.gmra.mxu0 %vm333_vm0, %v274_v30 }
  0x57   : > { %1266 = vmatmul.msk.f32.gmra.mxu1 %vm333_vm0, %v298_v31  ;;  %1279 = vmatmul.msk.f32.gmra.mxu2 %vm333_vm0, %v311_v32  ;;  %p1400_p0 = pneg %p1399_p13 }
  0x59   : > { %1288 = vmatmul.msk.f32.gmra.mxu3 %vm333_vm0, %v320_v33  ;;  %p1405_p5 = pnand %p1404_p3, %p1400_p0 }
  0x5e   : > { %1243 = vmatmul.msk.f32.gmra.mxu0 %vm333_vm0, %v275_v34 }
  0x5f   : > { %1267 = vmatmul.msk.f32.gmra.mxu1 %vm333_vm0, %v299_v35  ;;  %1280 = vmatmul.msk.f32.gmra.mxu2 %vm333_vm0, %v312_v36 }
  0x61   : > { %1289 = vmatmul.msk.f32.gmra.mxu3 %vm333_vm0, %v321_v37 }
  0x66   : > { %1244 = vmatmul.msk.f32.gmra.mxu0 %vm333_vm0, %v276_v38 }
  0x67   : > { %1268 = vmatmul.msk.f32.gmra.mxu1 %vm333_vm0, %v300_v39 }
  0x69   : > { %1290 = vmatmul.msk.f32.gmra.mxu3 %vm333_vm0, %v322_v40 }
  0x6e   : > { %1245 = vmatmul.msk.f32.gmra.mxu0 %vm333_vm0, %v277_v41 }
  0x6f   : > { %1269 = vmatmul.msk.f32.gmra.mxu1 %vm333_vm0, %v301_v42 }
  0x71   : > { %1291 = vmatmul.msk.f32.gmra.mxu3 %vm333_vm0, %v323_v43 }
  0x76   : > { %1246 = vmatmul.msk.f32.gmra.mxu0 %vm333_vm0, %v278_v44 }
  0x77   : > { %1270 = vmatmul.msk.f32.gmra.mxu1 %vm333_vm0, %v302_v45 }
  0x79   : > { %1292 = vmatmul.msk.f32.gmra.mxu3 %vm333_vm0, %v324_v46 }
  0x7e   : > { %1247 = vmatmul.msk.f32.gmra.mxu0 %vm333_vm0, %v279_v47 }
  0x7f   : > { %1271 = vmatmul.msk.f32.gmra.mxu1 %vm333_vm0, %v303_v48 }
  0x81   : > { %1293 = vmatmul.msk.f32.gmra.mxu3 %vm333_vm0, %v325_v49 }
  0x86   : > { %1248 = vmatmul.msk.f32.gmra.mxu0 %vm333_vm0, %v280_v50 }
  0x89   : > { %1294 = vmatmul.msk.f32.gmra.mxu3 %vm333_vm0, %v326_v51 }
  0x8e   : > { %1249 = vmatmul.msk.f32.gmra.mxu0 %vm333_vm0, %v281_v52 }
  0x91   : > { %1295 = vmatmul.msk.f32.gmra.mxu3 %vm333_vm0, %v327_v53 }
  0x96   : > { %1250 = vmatmul.msk.f32.gmra.mxu0 %vm333_vm0, %v282_v54 }
  0x99   : > { %1296 = vmatmul.msk.f32.gmra.mxu3 %vm333_vm0, %v328_v55 }
  0x9b   : > { %v1730_v56 = vpop.f32.mrf.mxu0 }
  0x9c   : > { %735 = vst [vmem:[%s1733_s14] sm:$0xff] %v1730_v56  ;;  %v1737_v58 = vpop.f32.mrf.mxu1 }
  0x9d   : > { %759 = vst [vmem:[%s1733_s14 + $0xc0] sm:$0xff] %v1737_v58 }
  0x9e   : > { %1251 = vmatmul.msk.f32.gmra.mxu0 %vm333_vm0, %v283_v57 }
  0xa1   : > { %1297 = vmatmul.msk.f32.gmra.mxu3 %vm333_vm0, %v329_v59 }
  0xa2   : > { %v1744_v60 = vpop.f32.mrf.mxu2 }
  0xa3   : > { %772 = vst [vmem:[%s1733_s14 + $0x128] sm:$0xff] %v1744_v60  ;;  %v1748_v61 = vpop.f32.mrf.mxu0 }
  0xa4   : > { %736 = vst [vmem:[%s1733_s14 + $0x8] sm:$0xff] %v1748_v61  ;;  %v1753_v63 = vpop.f32.mrf.mxu1  ;;  %v1755_v0 = vpop.f32.mrf.mxu3 }
  0xa5   : > { %760 = vst [vmem:[%s1733_s14 + $0xc8] sm:$0xff] %v1753_v63 }
  0xa6   : > { %1252 = vmatmul.msk.f32.gmra.mxu0 %vm333_vm0, %v284_v62  ;;  %781 = vst [vmem:[%s1733_s14 + $0x170] sm:$0xff] %v1755_v0 }
  0xa9   : > { %1298 = vmatmul.msk.f32.gmra.mxu3 %vm333_vm0, %v330_v1  ;;  %v905_v1 = vmul.f32 %v1753_v63, %v1753_v63 }
  0xaa   : > { %v1764_v2 = vpop.f32.mrf.mxu2 }
  0xab   : > { %773 = vst [vmem:[%s1733_s14 + $0x130] sm:$0xff] %v1764_v2  ;;  %v1768_v3 = vpop.f32.mrf.mxu0 }
  0xac   : > { %737 = vst [vmem:[%s1733_s14 + $0x10] sm:$0xff] %v1768_v3  ;;  %v1773_v5 = vpop.f32.mrf.mxu1  ;;  %v1775_v6 = vpop.f32.mrf.mxu3 }
  0xad   : > { %761 = vst [vmem:[%s1733_s14 + $0xd0] sm:$0xff] %v1773_v5  ;;  %839 = vmatpush.msrb.mxu3 %v1775_v6  ;;  %v906_v59 = vmul.f32 %v1773_v5, %v1773_v5 }
  0xae   : > { %1253 = vmatmul.msk.f32.gmra.mxu0 %vm333_vm0, %v285_v4  ;;  %782 = vst [vmem:[%s1733_s14 + $0x178] sm:$0xff] %v1775_v6  ;;  %v904_v4 = vmul.f32 %v1737_v58, %v1737_v58 }
  0xaf   : > { %840 = vmatpush.msrb.mxu3 %v1755_v0 }
  0xb2   : > { %v1784_v7 = vpop.f32.mrf.mxu2 }
  0xb3   : > { %774 = vst [vmem:[%s1733_s14 + $0x138] sm:$0xff] %v1784_v7  ;;  %v1788_v8 = vpop.f32.mrf.mxu0 }
  0xb4   : > { %738 = vst [vmem:[%s1733_s14 + $0x18] sm:$0xff] %v1788_v8  ;;  %v1793_v10 = vpop.f32.mrf.mxu1  ;;  %v1795_v11 = vpop.f32.mrf.mxu3 }
  0xb5   : > { %762 = vst [vmem:[%s1733_s14 + $0xd8] sm:$0xff] %v1793_v10  ;;  %v907_v55 = vmul.f32 %v1793_v10, %v1793_v10 }
  0xb6   : > { %1254 = vmatmul.msk.f32.gmra.mxu0 %vm333_vm0, %v286_v9  ;;  %783 = vst [vmem:[%s1733_s14 + $0x180] sm:$0xff] %v1795_v11 }
  0xba   : > { %v1802_v12 = vpop.f32.mrf.mxu2 }
  0xbb   : > { %775 = vst [vmem:[%s1733_s14 + $0x140] sm:$0xff] %v1802_v12  ;;  %v1806_v13 = vpop.f32.mrf.mxu0 }
  0xbc   : > { %739 = vst [vmem:[%s1733_s14 + $0x20] sm:$0xff] %v1806_v13  ;;  %v1811_v15 = vpop.f32.mrf.mxu1  ;;  %v1813_v16 = vpop.f32.mrf.mxu3 }
  0xbd   : > { %763 = vst [vmem:[%s1733_s14 + $0xe0] sm:$0xff] %v1811_v15  ;;  %v908_v54 = vmul.f32 %v1811_v15, %v1811_v15 }
  0xbe   : > { %1255 = vmatmul.msk.f32.gmra.mxu0 %vm333_vm0, %v287_v14  ;;  %784 = vst [vmem:[%s1733_s14 + $0x188] sm:$0xff] %v1813_v16 }
  0xc2   : > { %v1820_v17 = vpop.f32.mrf.mxu2 }
  0xc3   : > { %776 = vst [vmem:[%s1733_s14 + $0x148] sm:$0xff] %v1820_v17  ;;  %v1824_v18 = vpop.f32.mrf.mxu0 }
  0xc4   : > { %740 = vst [vmem:[%s1733_s14 + $0x28] sm:$0xff] %v1824_v18  ;;  %v1829_v20 = vpop.f32.mrf.mxu1  ;;  %v1831_v21 = vpop.f32.mrf.mxu3 }
  0xc5   : > { %764 = vst [vmem:[%s1733_s14 + $0xe8] sm:$0xff] %v1829_v20  ;;  %v909_v53 = vmul.f32 %v1829_v20, %v1829_v20 }
  0xc6   : > { %1256 = vmatmul.msk.f32.gmra.mxu0 %vm333_vm0, %v288_v19  ;;  %785 = vst [vmem:[%s1733_s14 + $0x190] sm:$0xff] %v1831_v21 }
  0xca   : > { %v1838_v22 = vpop.f32.mrf.mxu2 }
  0xcb   : > { %777 = vst [vmem:[%s1733_s14 + $0x150] sm:$0xff] %v1838_v22  ;;  %v1842_v23 = vpop.f32.mrf.mxu0 }
  0xcc   : > { %741 = vst [vmem:[%s1733_s14 + $0x30] sm:$0xff] %v1842_v23  ;;  %v1847_v25 = vpop.f32.mrf.mxu1  ;;  %v1849_v26 = vpop.f32.mrf.mxu3 }
  0xcd   : > { %765 = vst [vmem:[%s1733_s14 + $0xf0] sm:$0xff] %v1847_v25  ;;  %v910_v51 = vmul.f32 %v1847_v25, %v1847_v25 }
  0xce   : > { %1257 = vmatmul.msk.f32.gmra.mxu0 %vm333_vm0, %v289_v24  ;;  %786 = vst [vmem:[%s1733_s14 + $0x198] sm:$0xff] %v1849_v26 }
  0xd2   : > { %v1856_v27 = vpop.f32.mrf.mxu2 }
  0xd3   : > { %778 = vst [vmem:[%s1733_s14 + $0x158] sm:$0xff] %v1856_v27  ;;  %v1860_v28 = vpop.f32.mrf.mxu0 }
  0xd4   : > { %742 = vst [vmem:[%s1733_s14 + $0x38] sm:$0xff] %v1860_v28  ;;  %v636_v30 = vpop.f32.mrf.mxu1  ;;  %v1865_v31 = vpop.f32.mrf.mxu3 }
  0xd5   : > { %766 = vst [vmem:[%s1733_s14 + $0xf8] sm:$0xff] %v636_v30  ;;  %819 = vmatpush.msrb.mxu2 %v636_v30  ;;  %v911_v49 = vmul.f32 %v636_v30, %v636_v30 }
  0xd6   : > { %1258 = vmatmul.msk.f32.gmra.mxu0 %vm333_vm0, %v290_v29  ;;  %787 = vst [vmem:[%s1733_s14 + $0x1a0] sm:$0xff] %v1865_v31 }
  0xd7   : > { %820 = vmatpush.msrb.mxu2 %v1847_v25 }
  0xd9   : > { %821 = vmatpush.msrb.mxu2 %v1829_v20  ;;  %v1521_v20 = vmov 1.0  }
  0xda   : > { %v1873_v32 = vpop.f32.mrf.mxu2 }
  0xdb   : > { %779 = vst [vmem:[%s1733_s14 + $0x160] sm:$0xff] %v1873_v32  ;;  %v1877_v33 = vpop.f32.mrf.mxu0  ;;  %822 = vmatpush.msrb.mxu2 %v1811_v15 }
  0xdc   : > { %743 = vst [vmem:[%s1733_s14 + $0x40] sm:$0xff] %v1877_v33  ;;  %v1882_v34 = vpop.f32.mrf.mxu1  ;;  %v1884_v35 = vpop.f32.mrf.mxu3 }
  0xdd   : > { %767 = vst [vmem:[%s1733_s14 + $0x100] sm:$0xff] %v1882_v34  ;;  %823 = vmatpush.msrb.mxu2 %v1793_v10 }
  0xde   : > { %788 = vst [vmem:[%s1733_s14 + $0x1a8] sm:$0xff] %v1884_v35 }
  0xdf   : > { %824 = vmatpush.msrb.mxu2 %v1773_v5 }
  0xe1   : > { %825 = vmatpush.msrb.mxu2 %v1753_v63 }
  0xe2   : > { %v1893_v36 = vpop.f32.mrf.mxu2 }
  0xe3   : > { %780 = vst [vmem:[%s1733_s14 + $0x168] sm:$0xff] %v1893_v36  ;;  %841 = vmatpush.msrb.mxu3 %v1893_v36  ;;  %v1898_v37 = vpop.f32.mrf.mxu0  ;;  %826 = vmatpush.msrb.mxu2 %v1737_v58 }
  0xe4   : > { %744 = vst [vmem:[%s1733_s14 + $0x48] sm:$0xff] %v1898_v37  ;;  %v1903_v38 = vpop.f32.mrf.mxu1  ;;  %v1905_v39 = vpop.f32.mrf.mxu3 }
  0xe5   : > { %768 = vst [vmem:[%s1733_s14 + $0x108] sm:$0xff] %v1903_v38  ;;  %842 = vmatpush.msrb.mxu3 %v1873_v32 }
  0xe6   : > { %789 = vst [vmem:[%s1733_s14 + $0x1b0] sm:$0xff] %v1905_v39 }
  0xe7   : > { %843 = vmatpush.msrb.mxu3 %v1856_v27 }
  0xe9   : > { %844 = vmatpush.msrb.mxu3 %v1838_v22 }
  0xeb   : > { %845 = vmatpush.msrb.mxu3 %v1820_v17  ;;  %v1915_v40 = vpop.f32.mrf.mxu0 }
  0xec   : > { %745 = vst [vmem:[%s1733_s14 + $0x50] sm:$0xff] %v1915_v40  ;;  %v1919_v41 = vpop.f32.mrf.mxu1  ;;  %v1921_v42 = vpop.f32.mrf.mxu3 }
  0xed   : > { %769 = vst [vmem:[%s1733_s14 + $0x110] sm:$0xff] %v1919_v41  ;;  %846 = vmatpush.msrb.mxu3 %v1802_v12 }
  0xee   : > { %790 = vst [vmem:[%s1733_s14 + $0x1b8] sm:$0xff] %v1921_v42 }
  0xef   : > { %847 = vmatpush.msrb.mxu3 %v1784_v7 }
  0xf1   : > { %848 = vmatpush.msrb.mxu3 %v1764_v2 }
  0xf3   : > { %849 = vmatpush.msrb.mxu3 %v1744_v60  ;;  %v1931_v43 = vpop.f32.mrf.mxu0 }
  0xf4   : > { %746 = vst [vmem:[%s1733_s14 + $0x58] sm:$0xff] %v1931_v43  ;;  %v1935_v44 = vpop.f32.mrf.mxu1  ;;  %v1937_v45 = vpop.f32.mrf.mxu3 }
  0xf5   : > { %770 = vst [vmem:[%s1733_s14 + $0x118] sm:$0xff] %v1935_v44 }
  0xf6   : > { %791 = vst [vmem:[%s1733_s14 + $0x1c0] sm:$0xff] %v1937_v45 }
  0xfb   : > { %v1943_v46 = vpop.f32.mrf.mxu0 }
  0xfc   : > { %747 = vst [vmem:[%s1733_s14 + $0x60] sm:$0xff] %v1943_v46  ;;  %v1947_v47 = vpop.f32.mrf.mxu1  ;;  %v1949_v48 = vpop.f32.mrf.mxu3 }
  0xfd   : > { %771 = vst [vmem:[%s1733_s14 + $0x120] sm:$0xff] %v1947_v47  ;;  %850 = vmatpush.msrb.mxu3 %v1947_v47 }
  0xfe   : > { %792 = vst [vmem:[%s1733_s14 + $0x1c8] sm:$0xff] %v1949_v48 }
  0xff   : > { %851 = vmatpush.msrb.mxu3 %v1935_v44 }
 0x101   : > { %852 = vmatpush.msrb.mxu3 %v1919_v41 }
 0x103   : > { %853 = vmatpush.msrb.mxu3 %v1903_v38  ;;  %v1959_v50 = vpop.f32.mrf.mxu0 }
 0x104   : > { %748 = vst [vmem:[%s1733_s14 + $0x68] sm:$0xff] %v1959_v50  ;;  %v1965_v52 = vpop.f32.mrf.mxu3 }
 0x105   : > { %854 = vmatpush.msrb.mxu3 %v1882_v34  ;;  %793 = vst [vmem:[%s1733_s14 + $0x1d0] sm:$0xff] %v1965_v52 }
 0x106   : > { %855 = vmatmul.f32.vlgmr.msrb.gmra.mxu3 %v1521_v20 }
 0x107   : > { %964 = vmatpush.msra.mxu3 %v911_v49  ;;  %v927_v49 = vmul.f32 %v1775_v6, %v1775_v6 }
 0x109   : > { %965 = vmatpush.msra.mxu3 %v910_v51  ;;  %v926_v51 = vmul.f32 %v1755_v0, %v1755_v0  ;;  %v923_v0 = vmul.f32 %v1856_v27, %v1856_v27  ;;  %v920_v27 = vmul.f32 %v1802_v12, %v1802_v12  ;;  %v918_v12 = vmul.f32 %v1764_v2, %v1764_v2 }
 0x10a   : > { %v915_v2 = vmul.f32 %v1935_v44, %v1935_v44  ;;  %v889_v44 = vmul.f32 %v1898_v37, %v1898_v37 }
 0x10b   : > { %966 = vmatpush.msra.mxu3 %v909_v53  ;;  %v1976_v57 = vpop.f32.mrf.mxu0  ;;  %v925_v53 = vmul.f32 %v1893_v36, %v1893_v36 }
 0x10c   : > { %749 = vst [vmem:[%s1733_s14 + $0x70] sm:$0xff] %v1976_v57  ;;  %v1982_v62 = vpop.f32.mrf.mxu3 }
 0x10d   : > { %967 = vmatpush.msra.mxu3 %v908_v54  ;;  %794 = vst [vmem:[%s1733_s14 + $0x1d8] sm:$0xff] %v1982_v62 }
 0x10f   : > { %968 = vmatpush.msra.mxu3 %v907_v55 }
 0x111   : > { %969 = vmatpush.msra.mxu3 %v906_v59  ;;  %v924_v59 = vmul.f32 %v1873_v32, %v1873_v32  ;;  %v921_v32 = vmul.f32 %v1820_v17, %v1820_v17  ;;  %v919_v17 = vmul.f32 %v1784_v7, %v1784_v7  ;;  %v917_v7 = vmul.f32 %v1744_v60, %v1744_v60 }
 0x112   : > { %v891_v60 = vmul.f32 %v1931_v43, %v1931_v43 }
 0x113   : > { %970 = vmatpush.msra.mxu3 %v905_v1  ;;  %v1990_v9 = vpop.f32.mrf.mxu0 }
 0x114   : > { %750 = vst [vmem:[%s1733_s14 + $0x78] sm:$0xff] %v1990_v9  ;;  %799 = vmatpush.msrb.mxu1 %v1990_v9  ;;  %v1995_v5 = vpop.f32.mrf.mxu3 }
 0x115   : > { %971 = vmatpush.msra.mxu3 %v904_v4  ;;  %795 = vst [vmem:[%s1733_s14 + $0x1e0] sm:$0xff] %v1995_v5  ;;  %v922_v4 = vmul.f32 %v1838_v22, %v1838_v22 }
 0x116   : > { %800 = vmatpush.msrb.mxu1 %v1976_v57 }
 0x118   : > { %801 = vmatpush.msrb.mxu1 %v1959_v50 }
 0x11a   : > { %802 = vmatpush.msrb.mxu1 %v1943_v46 }
 0x11b   : > { %v2002_v58 = vpop.f32.mrf.mxu0 }
 0x11c   : > { %751 = vst [vmem:[%s1733_s14 + $0x80] sm:$0xff] %v2002_v58  ;;  %803 = vmatpush.msrb.mxu1 %v1931_v43  ;;  %v2007_v63 = vpop.f32.mrf.mxu3  ;;  %v888_v43 = vmul.f32 %v1877_v33, %v1877_v33 }
 0x11d   : > { %796 = vst [vmem:[%s1733_s14 + $0x1e8] sm:$0xff] %v2007_v63 }
 0x11e   : > { %804 = vmatpush.msrb.mxu1 %v1915_v40 }
 0x120   : > { %805 = vmatpush.msrb.mxu1 %v1898_v37  ;;  %v886_v37 = vmul.f32 %v1842_v23, %v1842_v23 }
 0x122   : > { %806 = vmatpush.msrb.mxu1 %v1877_v33  ;;  %v884_v33 = vmul.f32 %v1806_v13, %v1806_v13 }
 0x123   : > { %v2014_v10 = vpop.f32.mrf.mxu0 }
 0x124   : > { %752 = vst [vmem:[%s1733_s14 + $0x88] sm:$0xff] %v2014_v10  ;;  %807 = vmatpush.msrb.mxu1 %v1860_v28  ;;  %v2019_v14 = vpop.f32.mrf.mxu3  ;;  %v897_v22 = vmul.f32 %v2014_v10, %v2014_v10 }
 0x125   : > { %797 = vst [vmem:[%s1733_s14 + $0x1f0] sm:$0xff] %v2019_v14 }
 0x126   : > { %808 = vmatpush.msrb.mxu1 %v1842_v23  ;;  %v881_v23 = vmul.f32 %v1748_v61, %v1748_v61 }
 0x128   : > { %809 = vmatpush.msrb.mxu1 %v1824_v18 }
 0x12a   : > { %810 = vmatpush.msrb.mxu1 %v1806_v13 }
 0x12b   : > { %v2026_v15 = vpop.f32.mrf.mxu0 }
 0x12c   : > { %753 = vst [vmem:[%s1733_s14 + $0x90] sm:$0xff] %v2026_v15  ;;  %811 = vmatpush.msrb.mxu1 %v1788_v8  ;;  %v2031_v19 = vpop.f32.mrf.mxu3 }
 0x12d   : > { %798 = vst [vmem:[%s1733_s14 + $0x1f8] sm:$0xff] %v2031_v19  ;;  %v943_v13 = vmul.f32 %v2031_v19, %v2031_v19 }
 0x12e   : > { %812 = vmatpush.msrb.mxu1 %v1768_v3 }
 0x130   : > { %813 = vmatpush.msrb.mxu1 %v1748_v61  ;;  %v940_v61 = vmul.f32 %v1995_v5, %v1995_v5 }
 0x132   : > { %814 = vmatpush.msrb.mxu1 %v1730_v56 }
 0x133   : > { %v600_v24 = vpop.f32.mrf.mxu0  ;;  %815 = vmatmul.f32.vlgmr.msrb.gmra.mxu1 %v1521_v20 }
 0x134   : > { %859 = vmatpush.msra.mxu1 %v2031_v19  ;;  %754 = vst [vmem:[%s1733_s14 + $0x98] sm:$0xff] %v600_v24 }
 0x136   : > { %860 = vmatpush.msra.mxu1 %v2019_v14 }
 0x138   : > { %861 = vmatpush.msra.mxu1 %v2007_v63 }
 0x13a   : > { %862 = vmatpush.msra.mxu1 %v1995_v5  ;;  %v935_v5 = vmul.f32 %v1921_v42, %v1921_v42 }
 0x13b   : > { %v603_v25 = vpop.f32.mrf.mxu0 }
 0x13c   : > { %863 = vmatpush.msra.mxu1 %v1982_v62  ;;  %755 = vst [vmem:[%s1733_s14 + $0xa0] sm:$0xff] %v603_v25  ;;  %v900_v36 = vmul.f32 %v603_v25, %v603_v25 }
 0x13e   : > { %864 = vmatpush.msra.mxu1 %v1965_v52 }
 0x140   : > { %865 = vmatpush.msra.mxu1 %v1949_v48 }
 0x142   : > { %866 = vmatpush.msra.mxu1 %v1937_v45 }
 0x143   : > { %v606_v29 = vpop.f32.mrf.mxu0 }
 0x144   : > { %867 = vmatpush.msra.mxu1 %v1921_v42  ;;  %756 = vst [vmem:[%s1733_s14 + $0xa8] sm:$0xff] %v606_v29  ;;  %v901_v1 = vmul.f32 %v606_v29, %v606_v29  ;;  %v930_v42 = vmul.f32 %v1831_v21, %v1831_v21 }
 0x146   : > { %868 = vmatpush.msra.mxu1 %v1905_v39 }
 0x148   : > { %869 = vmatpush.msra.mxu1 %v1884_v35 }
 0x14a   : > { %870 = vmatpush.msra.mxu1 %v1865_v31 }
 0x14b   : > { %v609_v30 = vpop.f32.mrf.mxu0 }
 0x14c   : > { %871 = vmatpush.msra.mxu1 %v1849_v26  ;;  %757 = vst [vmem:[%s1733_s14 + $0xb0] sm:$0xff] %v609_v30  ;;  %v902_v6 = vmul.f32 %v609_v30, %v609_v30 }
 0x14e   : > { %872 = vmatpush.msra.mxu1 %v1831_v21 }
 0x150   : > { %873 = vmatpush.msra.mxu1 %v1813_v16 }
 0x152   : > { %874 = vmatpush.msra.mxu1 %v1795_v11 }
 0x153   : > { %v612_v54 = vpop.f32.mrf.mxu0  ;;  %875 = vmatmul.f32.vlgmr.msra.gmra.mxu1 %v1521_v20 }
 0x154   : > { %984 = vmatpush.msrb.mxu1 %v927_v49  ;;  %758 = vst [vmem:[%s1733_s14 + $0xb8] sm:$0xff] %v612_v54  ;;  %v903_v55 = vmul.f32 %v612_v54, %v612_v54  ;;  %827 = vmatpush.msrb.mxu2 %v612_v54  ;;  %v899_v49 = vmul.f32 %v600_v24, %v600_v24 }
 0x156   : > { %985 = vmatpush.msrb.mxu1 %v926_v51  ;;  %828 = vmatpush.msrb.mxu2 %v609_v30 }
 0x157   : > { %972 = vmatpush.msra.mxu3 %v903_v55 }
 0x158   : > { %986 = vmatpush.msrb.mxu1 %v925_v53  ;;  %829 = vmatpush.msrb.mxu2 %v606_v29  ;;  %v898_v29 = vmul.f32 %v2026_v15, %v2026_v15 }
 0x159   : > { %973 = vmatpush.msra.mxu3 %v902_v6 }
 0x15a   : > { %987 = vmatpush.msrb.mxu1 %v924_v59  ;;  %830 = vmatpush.msrb.mxu2 %v603_v25  ;;  %v912_v25 = vmul.f32 %v1882_v34, %v1882_v34  ;;  %v883_v34 = vmul.f32 %v1788_v8, %v1788_v8  ;;  %v942_v8 = vmul.f32 %v2019_v14, %v2019_v14 }
 0x15b   : > { %974 = vmatpush.msra.mxu3 %v901_v1  ;;  %v937_v14 = vmul.f32 %v1949_v48, %v1949_v48  ;;  %v932_v48 = vmul.f32 %v1865_v31, %v1865_v31 }
 0x15c   : > { %988 = vmatpush.msrb.mxu1 %v923_v0  ;;  %831 = vmatpush.msrb.mxu2 %v600_v24  ;;  %v895_v24 = vmul.f32 %v1990_v9, %v1990_v9  ;;  %v916_v9 = vmul.f32 %v1947_v47, %v1947_v47  ;;  %v890_v47 = vmul.f32 %v1915_v40, %v1915_v40 }
 0x15d   : > { %975 = vmatpush.msra.mxu3 %v900_v36  ;;  %v887_v40 = vmul.f32 %v1860_v28, %v1860_v28  ;;  %v882_v28 = vmul.f32 %v1768_v3, %v1768_v3  ;;  %v941_v3 = vmul.f32 %v2007_v63, %v2007_v63  ;;  %v936_v63 = vmul.f32 %v1937_v45, %v1937_v45 }
 0x15e   : > { %989 = vmatpush.msrb.mxu1 %v922_v4  ;;  %832 = vmatpush.msrb.mxu2 %v2026_v15  ;;  %v896_v15 = vmul.f32 %v2002_v58, %v2002_v58  ;;  %v931_v45 = vmul.f32 %v1849_v26, %v1849_v26 }
 0x15f   : > { %976 = vmatpush.msra.mxu3 %v899_v49 }
 0x160   : > { %990 = vmatpush.msrb.mxu1 %v921_v32  ;;  %833 = vmatpush.msrb.mxu2 %v2014_v10  ;;  %v894_v10 = vmul.f32 %v1976_v57, %v1976_v57  ;;  %v892_v57 = vmul.f32 %v1943_v46, %v1943_v46  ;;  %v913_v46 = vmul.f32 %v1903_v38, %v1903_v38 }
 0x161   : > { %977 = vmatpush.msra.mxu3 %v898_v29  ;;  %v885_v38 = vmul.f32 %v1824_v18, %v1824_v18  ;;  %v880_v18 = vmul.f32 %v1730_v56, %v1730_v56  ;;  %v939_v56 = vmul.f32 %v1982_v62, %v1982_v62  ;;  %v934_v62 = vmul.f32 %v1905_v39, %v1905_v39 }
 0x162   : > { %991 = vmatpush.msrb.mxu1 %v920_v27  ;;  %834 = vmatpush.msrb.mxu2 %v2002_v58  ;;  %v893_v58 = vmul.f32 %v1959_v50, %v1959_v50  ;;  %v914_v50 = vmul.f32 %v1919_v41, %v1919_v41  ;;  %v938_v41 = vmul.f32 %v1965_v52, %v1965_v52 }
 0x163   : > { %978 = vmatpush.msra.mxu3 %v897_v22  ;;  %835 = vmatmul.f32.vlgmr.msrb.gmra.mxu2 %v1521_v20  ;;  %v933_v52 = vmul.f32 %v1884_v35, %v1884_v35  ;;  %v929_v39 = vmul.f32 %v1813_v16, %v1813_v16  ;;  %v928_v35 = vmul.f32 %v1795_v11, %v1795_v11 }
 0x164   : > { %992 = vmatpush.msrb.mxu1 %v919_v17  ;;  %944 = vmatpush.msra.mxu2 %v895_v24 }
 0x165   : > { %979 = vmatpush.msra.mxu3 %v896_v15 }
 0x166   : > { %993 = vmatpush.msrb.mxu1 %v918_v12  ;;  %945 = vmatpush.msra.mxu2 %v894_v10 }
 0x167   : > { %980 = vmatmul.f32.vlgmr.msra.gmra.mxu3 %v1521_v20 }
 0x168   : > { %994 = vmatpush.msrb.mxu1 %v917_v7  ;;  %946 = vmatpush.msra.mxu2 %v893_v58 }
 0x16a   : > { %995 = vmatpush.msrb.mxu1 %v916_v9  ;;  %947 = vmatpush.msra.mxu2 %v892_v57 }
 0x16c   : > { %996 = vmatpush.msrb.mxu1 %v915_v2  ;;  %948 = vmatpush.msra.mxu2 %v891_v60 }
 0x16e   : > { %997 = vmatpush.msrb.mxu1 %v914_v50  ;;  %949 = vmatpush.msra.mxu2 %v890_v47 }
 0x170   : > { %998 = vmatpush.msrb.mxu1 %v913_v46  ;;  %950 = vmatpush.msra.mxu2 %v889_v44 }
 0x172   : > { %999 = vmatpush.msrb.mxu1 %v912_v25  ;;  %951 = vmatpush.msra.mxu2 %v888_v43 }
 0x173   : > { %1000 = vmatmul.f32.vlgmr.msrb.gmra.mxu1 %v1521_v20 }
 0x174   : > { %952 = vmatpush.msra.mxu2 %v887_v40 }
 0x176   : > { %953 = vmatpush.msra.mxu2 %v886_v37 }
 0x178   : > { %954 = vmatpush.msra.mxu2 %v885_v38 }
 0x17a   : > { %955 = vmatpush.msra.mxu2 %v884_v33 }
 0x17c   : > { %956 = vmatpush.msra.mxu2 %v883_v34 }
 0x17e   : > { %957 = vmatpush.msra.mxu2 %v882_v28 }
 0x180   : > { %958 = vmatpush.msra.mxu2 %v881_v23 }
 0x182   : > { %959 = vmatpush.msra.mxu2 %v880_v18 }
 0x183   : > { %960 = vmatmul.f32.vlgmr.msra.gmra.mxu2 %v1521_v20 }
 0x184   : > { %1004 = vmatpush.msrb.mxu2 %v943_v13 }
 0x186   : > { %1005 = vmatpush.msrb.mxu2 %v942_v8 }
 0x188   : > { %1006 = vmatpush.msrb.mxu2 %v941_v3 }
 0x18a   : > { %1007 = vmatpush.msrb.mxu2 %v940_v61 }
 0x18c   : > { %1008 = vmatpush.msrb.mxu2 %v939_v56 }
 0x18e   : > { %1009 = vmatpush.msrb.mxu2 %v938_v41 }
 0x190   : > { %1010 = vmatpush.msrb.mxu2 %v937_v14 }
 0x192   : > { %1011 = vmatpush.msrb.mxu2 %v936_v63 }
 0x194   : > { %1012 = vmatpush.msrb.mxu2 %v935_v5 }
 0x196   : > { %1013 = vmatpush.msrb.mxu2 %v934_v62 }
 0x198   : > { %1014 = vmatpush.msrb.mxu2 %v933_v52 }
 0x19a   : > { %1015 = vmatpush.msrb.mxu2 %v932_v48 }
 0x19c   : > { %1016 = vmatpush.msrb.mxu2 %v931_v45 }
 0x19e   : > { %1017 = vmatpush.msrb.mxu2 %v930_v42 }
 0x1a0   : > { %1018 = vmatpush.msrb.mxu2 %v929_v39 }
 0x1a2   : > { %1019 = vmatpush.msrb.mxu2 %v928_v35 }
 0x1a3   : > { %1020 = vmatmul.f32.vlgmr.msrb.gmra.mxu2 %v1521_v20 }
 0x1a4   : > { %1408 = shalt.err (!%p1405_p5)
}
 0x1a5   : > { %s1522_s14 = smov 128   ;;  %s1523_s24 = smov 8   ;;  %v856_v21 = vpop.f32.mrf.mxu3 }
 0x1a6   : > { %1313 = dma.vmem_to_hbm [thread:$0]  (%p1591_p4), %s1049_s5, 8192, %s1051_s6, %s1026_s7, %s1522_s14, %s1522_s14, %s1523_s24  }
 0x1a7   : > { %s1063_s30 = scalar_lea.hbm %s2254_s3, %s1511_s18  ;;  %s2260_s21 = sadd.s32 4294967295, %s1519_s20  }
 0x1a8   : > { %s2194_s22 = sand.u32 1, %s2260_s21   ;;  %s244_s8 = scalar_lea.vmem [#allocation4], %s1724_s12 }
 0x1a9   : > { %s1065_s9 = sshll.u32 %s244_s8, 4  ;;  %s1067_s10 = sshll.u32 %s1063_s30, 4  ;;  %s1066_s9 = int_to_ptr.vmem [resolvable:$true] %s1065_s9  ;;  %s1068_s10 = int_to_ptr.hbm [resolvable:$true] %s1067_s10 }
 0x1aa   : > { %s1031_s5 = scalar_lea.sflag [#allocation5], %s2194_s22  ;;  %s1423_s6 = sshra.s32 %s1068_s10, 4  ;;  %s1424_s6 = int_to_ptr.hbm [resolvable:$true] %s1423_s6 }
 0x1ab   : > { %s1425_s7 = scalar_lea.hbm %s1424_s6, 1  ;;  %s1429_s14 = scalar_lea.hbm %s2254_s3, 4 }
 0x1ac   : > { %p1426_p6 = scmp.ne.s32.totalorder %s1424_s6, %s1425_s7  ;;  %p1430_p10 = scmp.lt.s32.totalorder %s1424_s6, %s2254_s3 }
 0x1ad   : > { %p1431_p11 = scmp.lt.s32.totalorder %s1429_s14, %s1425_s7 }
 0x1ae   : > { %p1427_p7 = pnand %p1426_p6, %p1591_p4 }
 0x1af   : > { %p1432_p12 = por %p1431_p11, %p1430_p10 }
 0x1b0   : > { %v816_v11 = vpop.f32.mrf.mxu1  ;;  %p1428_p9 = pneg %p1427_p7 }
 0x1b2   : > { %p1433_p13 = pnand %p1432_p12, %p1428_p9 }
 0x1d0   : > { %v876_v31 = vpop.f32.mrf.mxu1 }
 0x1e6   : > { %v836_v16 = vpop.f32.mrf.mxu2 }
 0x1e7   : > { %v837_v26 = vadd.f32 %v836_v16, %v816_v11 }
 0x1e9   : > { %v857_v19 = vadd.f32 %v856_v21, %v837_v26 }
 0x1eb   : > { %v877_v20 = vadd.f32 %v876_v31, %v857_v19 }
 0x1ed   : > { %879 = vst [vmem:[%s244_s8] sm:$0x1] %v877_v20 }
 0x1ee   : > { %1436 = shalt.err (!%p1433_p13)
}
 0x1ef   : > { %1314 = dma.vmem_to_hbm [thread:$0]  (%p1591_p4), %s1066_s9, 16, %s1068_s10, %s1031_s5   ;;  %v981_v51 = vpop.f32.mrf.mxu3 }
 0x1f0   : > { %s1077_s21 = scalar_lea.hbm %s2255_s4, %s1511_s18  ;;  %v1001_v54 = vpop.f32.mrf.mxu1  ;;  %s250_s8 = scalar_lea.vmem [#allocation6], %s1724_s12 }
 0x1f1   : > { %s1079_s6 = sshll.u32 %s250_s8, 4  ;;  %s1081_s7 = sshll.u32 %s1077_s21, 4  ;;  %s1080_s6 = int_to_ptr.vmem [resolvable:$true] %s1079_s6  ;;  %s1082_s7 = int_to_ptr.hbm [resolvable:$true] %s1081_s7 }
 0x1f2   : > { %s1451_s11 = sshra.s32 %s1082_s7, 4  ;;  %s1457_s18 = scalar_lea.hbm %s2255_s4, 4  ;;  %s1452_s11 = int_to_ptr.hbm [resolvable:$true] %s1451_s11 }
 0x1f3   : > { %s1453_s9 = scalar_lea.hbm %s1452_s11, 1  ;;  %p1458_p3 = scmp.lt.s32.totalorder %s1452_s11, %s2255_s4 }
 0x1f4   : > { %p1454_p0 = scmp.ne.s32.totalorder %s1452_s11, %s1453_s9  ;;  %p1459_p5 = scmp.lt.s32.totalorder %s1457_s18, %s1453_s9 }
 0x1f6   : > { %p1455_p1 = pnand %p1454_p0, %p1591_p4  ;;  %p1460_p6 = por %p1459_p5, %p1458_p3 }
 0x1f8   : > { %p1456_p2 = pneg %p1455_p1 }
 0x1fa   : > { %p1461_p7 = pnand %p1460_p6, %p1456_p2 }
 0x206   : > { %v961_v30 = vpop.f32.mrf.mxu2 }
 0x207   : > { %v982_v53 = vadd.f32 %v981_v51, %v961_v30 }
 0x209   : > { %v1002_v55 = vadd.f32 %v1001_v54, %v982_v53 }
 0x226   : > { %v1021_v59 = vpop.f32.mrf.mxu2 }
 0x227   : > { %v1022_v6 = vadd.f32 %v1021_v59, %v1002_v55 }
 0x229   : > { %1024 = vst [vmem:[%s250_s8] sm:$0x1] %v1022_v6 }
 0x22a   : > { %1464 = shalt.err (!%p1461_p7)
}
 0x22b   : > { %1315 = dma.vmem_to_hbm [thread:$0]  (%p1591_p4), %s1080_s6, 16, %s1082_s7, %s1031_s5  }
 0x22c PF: > { %p1329_p9 = scmp.ge.s32.totalorder %s1519_s20, 2  ;;  %s1093_s24 = sand.u32 1, %s1499_s15  }
 0x22d   : > { %s1094_s26 = scalar_lea.sflag [#allocation3], %s1093_s24 }
 0x22e   : > { %p1320_p10 = pnand %p1329_p9, %p1600_p8 }
 0x230   : > { %p1321_p11 = pneg %p1320_p10 }
 0x232   : > { %1490 = dma.done.wait (%p1321_p11), %s1094_s26, 8192  }
 0x233   : > { %1492 = vsyncadd (%p1321_p11), %s1094_s26, 4294959104  ;;  %s2261_s29 = sadd.s32 4294967294, %s1519_s20  }
 0x234   : > { %s1103_s30 = sand.u32 1, %s2261_s29  }
 0x235   : > { %s1104_s21 = scalar_lea.sflag [#allocation5], %s1103_s30 }
 0x236   : > { %1494 = dma.done.wait (%p1321_p11), %s1104_s21, 32  }
 0x237   : > { %1496 = vsyncadd (%p1321_p11), %s1104_s21, 4294967264  ;;  %s21_s20 = sadd.s32 1, %s1519_s20   ;;  %s2262_s15 = smov %s1503_s16 }
 0x238   : > { %p18_p4 = scmp.ge.s32.totalorder %s21_s20, 6   ;;  %s2263_s16 = smov %s1507_s17 }
 0x239   : > { %s2264_s17 = smov %s1606_s28  ;;  %s2265_s18 = smov %s1515_s19 }
 0x23a   : > { %s2266_s19 = smov %s2268_s23  ;;  %20 = sbr.rel (!%p18_p4) target bundleno = 6 (0x6), region = 98 }
 0x23f   :  { %1118 = vsyncpa [#allocation3], 1 }
 0x240   :  { %1120 = vsyncpa [#allocation3 + $0x1], 1 }
 0x241   :  { %1121 = vsyncpa [#allocation5], 1 }
 0x242   :  { %1123 = vsyncpa [#allocation5 + $0x1], 1 }

</bundles_post_ra>
